<compile_context>
chip_gen: v5e
topology: v5e:2x2
jax: 0.10.0
libtpu: 0.0.40
codegen_flags: <defaults>
</compile_context>

<pallas_src>
import jax
import jax.numpy as jnp
from jax.experimental import pallas as pl
from jax.experimental.pallas import tpu as pltpu

IMG_SHAPE = 512   # flattened image size (multiple of 128 for clean tiling)
H1 = 256
H2 = 128
MAX_TILE_B = 512  # per-step overhead amortization; footprint << VMEM on all gens


def _leaky_relu(x, slope=0.2):
    return jnp.where(x > 0, x, slope * x)


def _round_up(n, m):
    return -(-n // m) * m


def _pick_tile(B):
    """Pick a batch tile (multiple of 8) and grid size.

    Large tiles amortize the ~0.35us per-grid-step overhead; when the batch is
    big enough we keep grid_b >= 2 so both v7x TensorCores get work.
    """
    b8 = max(8, _round_up(B, 8))
    tile_b = min(MAX_TILE_B, b8)
    if b8 > 8 and pl.cdiv(B, tile_b) < 2:
        tile_b = max(8, _round_up(-(-b8 // 2), 8))
    grid_b = pl.cdiv(B, tile_b)
    return tile_b, grid_b


def discriminator_kernel(x_ref, w1_ref, b1_ref, w2_ref, b2_ref,
                         w3_ref, b3_ref, o_ref):
    # fc1: cast x tile to bf16 in-kernel (VPU work hidden under DMA/MXU),
    # f32 accumulate; bias/activation in f32.
    x = x_ref[...].astype(jnp.bfloat16)
    h = jnp.dot(x, w1_ref[...], preferred_element_type=jnp.float32)
    h = _leaky_relu(h + b1_ref[...])
    # fc2
    h = jnp.dot(h.astype(jnp.bfloat16), w2_ref[...],
                preferred_element_type=jnp.float32)
    h = _leaky_relu(h + b2_ref[...])
    # fc3 (out_features = 1): VPU multiply by the broadcast w3 row + lane
    # reduction instead of a 127/128-dead MXU matmul; single-column epilogue.
    logits = jnp.sum(h * w3_ref[...], axis=-1, keepdims=True) + b3_ref[...]
    o_ref[...] = jax.nn.sigmoid(logits)


def discriminator_forward(x, kernel_params):
    """x: (B, IMG_SHAPE) float32. Returns (B, 1) float32."""
    w1b, b1, w2b, b2, w3_row, b3 = kernel_params
    B = x.shape[0]
    tile_b, grid_b = _pick_tile(B)

    return pl.pallas_call(
        discriminator_kernel,
        out_shape=jax.ShapeDtypeStruct((B, 1), jnp.float32),
        grid_spec=pl.GridSpec(
            grid=(grid_b,),
            in_specs=[
                pl.BlockSpec((tile_b, IMG_SHAPE), lambda i: (i, 0)),  # x tile
                pl.BlockSpec((IMG_SHAPE, H1), lambda i: (0, 0)),      # W1 (bf16)
                pl.BlockSpec((1, H1), lambda i: (0, 0)),              # b1
                pl.BlockSpec((H1, H2), lambda i: (0, 0)),             # W2 (bf16)
                pl.BlockSpec((1, H2), lambda i: (0, 0)),              # b2
                pl.BlockSpec((1, H2), lambda i: (0, 0)),              # w3 row (f32)
                pl.BlockSpec((1, 1), lambda i: (0, 0)),               # b3
            ],
            out_specs=pl.BlockSpec((tile_b, 1), lambda i: (i, 0)),
        ),
        compiler_params=pltpu.CompilerParams(
            dimension_semantics=("parallel",)),
    )(x, w1b, b1, w2b, b2, w3_row, b3)


def init_params(key):
    """Deterministic f32 master params mimicking nn.Linear (+-1/sqrt(fan_in))."""
    k1, k2, k3, k4, k5, k6 = jax.random.split(key, 6)

    def unif(k, shape, fan_in):
        bound = 1.0 / jnp.sqrt(fan_in)
        return jax.random.uniform(k, shape, jnp.float32, -bound, bound)

    w1 = unif(k1, (IMG_SHAPE, H1), IMG_SHAPE)
    b1 = unif(k2, (1, H1), IMG_SHAPE)
    w2 = unif(k3, (H1, H2), H1)
    b2 = unif(k4, (1, H2), H1)
    w3 = unif(k5, (H2, 1), H2)
    b3 = unif(k6, (1, 1), H2)
    return (w1, b1, w2, b2, w3, b3)


def prepare_kernel_params(params):
    """One-time prep: persistent bf16 weight copies + lane-friendly w3 row."""
    w1, b1, w2, b2, w3, b3 = params
    return (w1.astype(jnp.bfloat16), b1,
            w2.astype(jnp.bfloat16), b2,
            w3.reshape(1, H2),       # f32 row for the VPU epilogue
            b3.reshape(1, 1))


def reference_forward(x, params):
    """Pure-JAX f32 reference of the PyTorch forward (use_sigmoid=True)."""
    w1, b1, w2, b2, w3, b3 = params
    h = jnp.dot(x, w1) + b1
    h = jnp.where(h > 0, h, 0.2 * h)
    h = jnp.dot(h, w2) + b2
    h = jnp.where(h > 0, h, 0.2 * h)
    h = jnp.dot(h, w3) + b3
    return jax.nn.sigmoid(h)


if __name__ == "__main__":
    key = jax.random.PRNGKey(0)
    pkey, xkey1, xkey2 = jax.random.split(key, 3)
    params = init_params(pkey)
    kparams = prepare_kernel_params(params)

    # Small-batch case (single tile, exact multiple of 8).
    B = 8
    x = jax.random.normal(xkey1, (B, IMG_SHAPE), jnp.float32)
    out = jax.block_until_ready(discriminator_forward(x, kparams))
    ref = reference_forward(x, params)
    assert out.shape == (B, 1), out.shape
    # bf16 matmul operands with f32 accumulation -> relaxed tolerance.
    assert jnp.allclose(out, ref, atol=3e-2), (
        float(jnp.max(jnp.abs(out - ref))))

    # Larger batch: exercises the multi-tile parallel grid + ragged last tile.
    B2 = 200
    x2 = jax.random.normal(xkey2, (B2, IMG_SHAPE), jnp.float32)
    out2 = jax.block_until_ready(discriminator_forward(x2, kparams))
    ref2 = reference_forward(x2, params)
    assert out2.shape == (B2, 1), out2.shape
    assert jnp.allclose(out2, ref2, atol=3e-2), (
        float(jnp.max(jnp.abs(out2 - ref2))))

    print("KERNEL_OK")
</pallas_src>

<mosaic_0001>
module attributes {stable_mosaic.version = 11 : i64} {
  func.func @discriminator_kernel(%arg0: i32, %arg1: memref<8x512xf32, #tpu.memory_space<vmem>>, %arg2: memref<512x256xbf16, #tpu.memory_space<vmem>>, %arg3: memref<1x256xf32, #tpu.memory_space<vmem>>, %arg4: memref<256x128xbf16, #tpu.memory_space<vmem>>, %arg5: memref<1x128xf32, #tpu.memory_space<vmem>>, %arg6: memref<1x128xf32, #tpu.memory_space<vmem>>, %arg7: memref<1x1xf32, #tpu.memory_space<vmem>>, %arg8: memref<8x1xf32, #tpu.memory_space<vmem>>) attributes {dimension_semantics = [#tpu.dimension_semantics<parallel>], iteration_bounds = array<i64: 1>, scalar_prefetch = 0 : i64, scratch_operands = 0 : i64, tpu.core_type = #tpu.core_type<tc>, window_params = [{transform_indices = @transform_0, window_bounds = array<i64: 8, 512>}, {pipeline_mode = #tpu.pipeline_mode<synchronous>, transform_indices = @transform_1, window_bounds = array<i64: 512, 256>}, {pipeline_mode = #tpu.pipeline_mode<synchronous>, transform_indices = @transform_2, window_bounds = array<i64: 1, 256>}, {pipeline_mode = #tpu.pipeline_mode<synchronous>, transform_indices = @transform_3, window_bounds = array<i64: 256, 128>}, {pipeline_mode = #tpu.pipeline_mode<synchronous>, transform_indices = @transform_4, window_bounds = array<i64: 1, 128>}, {pipeline_mode = #tpu.pipeline_mode<synchronous>, transform_indices = @transform_5, window_bounds = array<i64: 1, 128>}, {pipeline_mode = #tpu.pipeline_mode<synchronous>, transform_indices = @transform_6, window_bounds = array<i64: 1, 1>}, {transform_indices = @transform_7, window_bounds = array<i64: 8, 1>}]} {
    %c0 = arith.constant 0 : index
    %c0_0 = arith.constant 0 : index
    %0 = vector.load %arg1[%c0, %c0_0] : memref<8x512xf32, #tpu.memory_space<vmem>>, vector<8x512xf32>
    %1 = arith.truncf %0 : vector<8x512xf32> to vector<8x512xbf16>
    %c0_1 = arith.constant 0 : index
    %c0_2 = arith.constant 0 : index
    %2 = vector.load %arg2[%c0_1, %c0_2] : memref<512x256xbf16, #tpu.memory_space<vmem>>, vector<512x256xbf16>
    %cst = arith.constant dense<0.000000e+00> : vector<8x256xf32>
    %3 = tpu.matmul %1, %2, %cst {dimension_numbers = #tpu.dot_dimension_numbers<[1], [0], [0], [1], [0, 0, 1, 1], [], []>} : vector<8x512xbf16>, vector<512x256xbf16>, vector<8x256xf32> -> vector<8x256xf32>
    %c0_3 = arith.constant 0 : index
    %c0_4 = arith.constant 0 : index
    %4 = vector.load %arg3[%c0_3, %c0_4] : memref<1x256xf32, #tpu.memory_space<vmem>>, vector<1x256xf32>
    %5 = vector.broadcast %4 : vector<1x256xf32> to vector<8x256xf32>
    %6 = arith.addf %3, %5 : vector<8x256xf32>
    %cst_5 = arith.constant 0.000000e+00 : f32
    %7 = vector.broadcast %cst_5 : f32 to vector<8x256xf32>
    %8 = arith.cmpf ogt, %6, %7 : vector<8x256xf32>
    %cst_6 = arith.constant 2.000000e-01 : f32
    %9 = vector.broadcast %cst_6 : f32 to vector<8x256xf32>
    %10 = arith.mulf %9, %6 : vector<8x256xf32>
    %11 = arith.select %8, %6, %10 : vector<8x256xi1>, vector<8x256xf32>
    %12 = arith.truncf %11 : vector<8x256xf32> to vector<8x256xbf16>
    %c0_7 = arith.constant 0 : index
    %c0_8 = arith.constant 0 : index
    %13 = vector.load %arg4[%c0_7, %c0_8] : memref<256x128xbf16, #tpu.memory_space<vmem>>, vector<256x128xbf16>
    %cst_9 = arith.constant dense<0.000000e+00> : vector<8x128xf32>
    %14 = tpu.matmul %12, %13, %cst_9 {dimension_numbers = #tpu.dot_dimension_numbers<[1], [0], [0], [1], [0, 0, 1, 1], [], []>} : vector<8x256xbf16>, vector<256x128xbf16>, vector<8x128xf32> -> vector<8x128xf32>
    %c0_10 = arith.constant 0 : index
    %c0_11 = arith.constant 0 : index
    %15 = vector.load %arg5[%c0_10, %c0_11] : memref<1x128xf32, #tpu.memory_space<vmem>>, vector<1x128xf32>
    %16 = vector.broadcast %15 : vector<1x128xf32> to vector<8x128xf32>
    %17 = arith.addf %14, %16 : vector<8x128xf32>
    %cst_12 = arith.constant 0.000000e+00 : f32
    %18 = vector.broadcast %cst_12 : f32 to vector<8x128xf32>
    %19 = arith.cmpf ogt, %17, %18 : vector<8x128xf32>
    %cst_13 = arith.constant 2.000000e-01 : f32
    %20 = vector.broadcast %cst_13 : f32 to vector<8x128xf32>
    %21 = arith.mulf %20, %17 : vector<8x128xf32>
    %22 = arith.select %19, %17, %21 : vector<8x128xi1>, vector<8x128xf32>
    %c0_14 = arith.constant 0 : index
    %c0_15 = arith.constant 0 : index
    %23 = vector.load %arg6[%c0_14, %c0_15] : memref<1x128xf32, #tpu.memory_space<vmem>>, vector<1x128xf32>
    %24 = vector.broadcast %23 : vector<1x128xf32> to vector<8x128xf32>
    %25 = arith.mulf %22, %24 : vector<8x128xf32>
    %cst_16 = arith.constant dense<0.000000e+00> : vector<8xf32>
    %26 = vector.multi_reduction <add>, %25, %cst_16 [1] : vector<8x128xf32> to vector<8xf32>
    %27 = vector.shape_cast %26 : vector<8xf32> to vector<8x1xf32>
    %c0_17 = arith.constant 0 : index
    %c0_18 = arith.constant 0 : index
    %28 = vector.load %arg7[%c0_17, %c0_18] : memref<1x1xf32, #tpu.memory_space<vmem>>, vector<1x1xf32>
    %29 = vector.broadcast %28 : vector<1x1xf32> to vector<8x1xf32>
    %30 = arith.addf %27, %29 : vector<8x1xf32>
    %31 = arith.negf %30 : vector<8x1xf32>
    %32 = math.exp %31 : vector<8x1xf32>
    %cst_19 = arith.constant 1.000000e+00 : f32
    %33 = vector.broadcast %cst_19 : f32 to vector<8x1xf32>
    %34 = arith.addf %33, %32 : vector<8x1xf32>
    %35 = arith.divf %33, %34 : vector<8x1xf32>
    %c0_20 = arith.constant 0 : index
    %c0_21 = arith.constant 0 : index
    %36 = vector.load %arg8[%c0_20, %c0_21] : memref<8x1xf32, #tpu.memory_space<vmem>>, vector<8x1xf32>
    tpu.vector_store %arg8[%c0_20, %c0_21], %35 {strides = array<i32>} : memref<8x1xf32, #tpu.memory_space<vmem>>, vector<8x1xf32>,
    return
  }
  func.func @transform_0(%arg0: i32) -> (i32, i32) {
    %c0_i32 = arith.constant 0 : i32
    %c0_i32_0 = arith.constant 0 : i32
    return %arg0, %c0_i32 : i32, i32
  }
  func.func @transform_1(%arg0: i32) -> (i32, i32) {
    %c0_i32 = arith.constant 0 : i32
    %c0_i32_0 = arith.constant 0 : i32
    %c0_i32_1 = arith.constant 0 : i32
    return %c0_i32, %c0_i32_0 : i32, i32
  }
  func.func @transform_2(%arg0: i32) -> (i32, i32) {
    %c0_i32 = arith.constant 0 : i32
    %c0_i32_0 = arith.constant 0 : i32
    %c0_i32_1 = arith.constant 0 : i32
    return %c0_i32, %c0_i32_0 : i32, i32
  }
  func.func @transform_3(%arg0: i32) -> (i32, i32) {
    %c0_i32 = arith.constant 0 : i32
    %c0_i32_0 = arith.constant 0 : i32
    %c0_i32_1 = arith.constant 0 : i32
    return %c0_i32, %c0_i32_0 : i32, i32
  }
  func.func @transform_4(%arg0: i32) -> (i32, i32) {
    %c0_i32 = arith.constant 0 : i32
    %c0_i32_0 = arith.constant 0 : i32
    %c0_i32_1 = arith.constant 0 : i32
    return %c0_i32, %c0_i32_0 : i32, i32
  }
  func.func @transform_5(%arg0: i32) -> (i32, i32) {
    %c0_i32 = arith.constant 0 : i32
    %c0_i32_0 = arith.constant 0 : i32
    %c0_i32_1 = arith.constant 0 : i32
    return %c0_i32, %c0_i32_0 : i32, i32
  }
  func.func @transform_6(%arg0: i32) -> (i32, i32) {
    %c0_i32 = arith.constant 0 : i32
    %c0_i32_0 = arith.constant 0 : i32
    %c0_i32_1 = arith.constant 0 : i32
    return %c0_i32, %c0_i32_0 : i32, i32
  }
  func.func @transform_7(%arg0: i32) -> (i32, i32) {
    %c0_i32 = arith.constant 0 : i32
    %c0_i32_0 = arith.constant 0 : i32
    return %arg0, %c0_i32 : i32, i32
  }
}

</mosaic_0001>

<bundles_post_ra>
// kernel: tpu_custom_call.1
= control target key start
LH: loop header
LB: loop body
LE: loop exit
PB: predicated region body
PF: predicated region fallthrough
CT: control target
= control target key end

     0   :  { %s1361_s0 = inlined_call_operand.hbm [shape: f32[8,512], index: 0, kind: input, shape index: {}]   ;;  %s1362_s1 = inlined_call_operand.hbm [shape: bf16[512,256], index: 1, kind: input, shape index: {}]   ;;  %s1363_s2 = inlined_call_operand.vmem [shape: f32[1,256], index: 2, kind: input, shape index: {}]   ;;  %s1364_s3 = inlined_call_operand.hbm [shape: bf16[256,128], index: 3, kind: input, shape index: {}]   ;;  %s1365_s4 = inlined_call_operand.vmem [shape: f32[1,128], index: 4, kind: input, shape index: {}]   ;;  %s1366_s5 = inlined_call_operand.vmem [shape: f32[1,128], index: 5, kind: input, shape index: {}]   ;;  %s1367_s6 = inlined_call_operand.<no memory space> [shape: f32[1,1], index: 6, kind: input, shape index: {}]   ;;  %s1368_s7 = inlined_call_operand.vmem [shape: f32[8,1], index: 7, kind: output, shape index: {}]  }
   0x1   :  { %v12_v0 = vstv %s1367_s6 }
   0x2   :  { %13 = vst [vmem:[#allocation2] sm:$0x1] %v12_v0 }
   0x3   :  { %14 = vsyncpa [#allocation4], 0 }
   0x4   :  { %15 = vsyncpa [#allocation6], 0  ;;  %s31_s28 = sshll.u32 %s1362_s1, 4  ;;  %s1274_s29 = smov [#allocation5]   ;;  %s32_s28 = int_to_ptr.hbm [resolvable:$true] %s31_s28 }
   0x5   :  { %s33_s30 = sshll.u32 %s1274_s29, 4  ;;  %s21_s10 = sshll.u32 %s1361_s0, 4  ;;  %s34_s30 = int_to_ptr.vmem [resolvable:$true] %s33_s30  ;;  %s22_s10 = int_to_ptr.hbm [resolvable:$true] %s21_s10 }
   0x6   :  { %s1275_s11 = smov 128   ;;  %s1276_s12 = smov 8  }
   0x7   :  { %39 = dma.hbm_to_vmem [thread:$0]  %s32_s28, 8192, %s34_s30, [#allocation6], %s1275_s11, %s1275_s11, %s1276_s12  }
   0x8   :  { %s1277_s6 = smov [#allocation3]   ;;  %s46_s16 = sshll.u32 %s1364_s3, 4  ;;  %s47_s16 = int_to_ptr.hbm [resolvable:$true] %s46_s16 }
   0x9   :  { %s23_s13 = sshll.u32 %s1277_s6, 4  ;;  %s1278_s1 = smov [#allocation7]   ;;  %s24_s13 = int_to_ptr.vmem [resolvable:$true] %s23_s13 }
   0xa   :  { %26 = dma.hbm_to_vmem [thread:$0]  %s22_s10, 512, %s24_s13, [#allocation4]  }
   0xb   :  { %s48_s17 = sshll.u32 %s1278_s1, 4  ;;  %s1279_s18 = smov 64   ;;  %s49_s17 = int_to_ptr.vmem [resolvable:$true] %s48_s17 }
   0xc   :  { %s1280_s19 = smov 4  }
   0xd   :  { %54 = dma.hbm_to_vmem [thread:$0]  %s47_s16, 2048, %s49_s17, [#allocation6], %s1279_s18, %s1279_s18, %s1280_s19  }
   0xe   :  { %1270 = dma.done.wait [#allocation4], 512  }
   0xf   :  { %1271 = vsyncadd [#allocation4], 4294966784 }
  0x10   :  { %1272 = dma.done.wait [#allocation6], 10240  }
  0x11   :  { %1273 = vsyncadd [#allocation6], 4294957056  ;;  %v841_v1 = vld [vmem:[#allocation5 + $0x70] sm:$0xf]  ;;  %v1119_v2 = vld [vmem:[#allocation5 + $0x74] sm:$0xf0] }
  0x12   :  { %v905_v3 = vld [vmem:[#allocation5 + $0xf0] sm:$0xf]  ;;  %v842_v4 = vor.u32 %v1119_v2, %v841_v1  ;;  %v1135_v5 = vld [vmem:[#allocation5 + $0xf4] sm:$0xf0]  ;;  %v833_v12 = vld [vmem:[#allocation5 + $0x60] sm:$0xf] }
  0x13   :  { %v969_v6 = vld [vmem:[#allocation5 + $0x170] sm:$0xf]  ;;  %v1151_v7 = vld [vmem:[#allocation5 + $0x174] sm:$0xf0]  ;;  %v906_v8 = vor.u32 %v1135_v5, %v905_v3  ;;  %v1117_v14 = vld [vmem:[#allocation5 + $0x64] sm:$0xf0] }
  0x14   :  { %v970_v9 = vor.u32 %v1151_v7, %v969_v6  ;;  %v1033_v10 = vld [vmem:[#allocation5 + $0x1f0] sm:$0xf]  ;;  %v1167_v11 = vld [vmem:[#allocation5 + $0x1f4] sm:$0xf0]  ;;  %471 = vmatpush.bf16.msra.mxu0 %v842_v4  ;;  %v897_v15 = vld [vmem:[#allocation5 + $0xe0] sm:$0xf]  ;;  %v834_v17 = vor.u32 %v1117_v14, %v833_v12 }
  0x15   :  { %v1034_v13 = vor.u32 %v1167_v11, %v1033_v10  ;;  %v1133_v16 = vld [vmem:[#allocation5 + $0xe4] sm:$0xf0]  ;;  %484 = vmatpush.bf16.msra.mxu1 %v906_v8  ;;  %v961_v19 = vld [vmem:[#allocation5 + $0x160] sm:$0xf]  ;;  %v825_v24 = vld [vmem:[#allocation5 + $0x50] sm:$0xf] }
  0x16   :  { %497 = vmatpush.bf16.msra.mxu2 %v970_v9  ;;  %v898_v18 = vor.u32 %v1133_v16, %v897_v15  ;;  %v1149_v20 = vld [vmem:[#allocation5 + $0x164] sm:$0xf0]  ;;  %v1025_v21 = vld [vmem:[#allocation5 + $0x1e0] sm:$0xf]  ;;  %v1115_v25 = vld [vmem:[#allocation5 + $0x54] sm:$0xf0] }
  0x17   :  { %510 = vmatpush.bf16.msra.mxu3 %v1034_v13  ;;  %v962_v22 = vor.u32 %v1149_v20, %v961_v19  ;;  %v1165_v23 = vld [vmem:[#allocation5 + $0x1e4] sm:$0xf0]  ;;  %v889_v27 = vld [vmem:[#allocation5 + $0xd0] sm:$0xf]  ;;  %v1131_v28 = vld [vmem:[#allocation5 + $0xd4] sm:$0xf0]  ;;  %v826_v30 = vor.u32 %v1115_v25, %v825_v24 }
  0x18   :  { %v1026_v26 = vor.u32 %v1165_v23, %v1025_v21  ;;  %v953_v29 = vld [vmem:[#allocation5 + $0x150] sm:$0xf]  ;;  %472 = vmatpush.bf16.msra.mxu0 %v834_v17  ;;  %v1147_v31 = vld [vmem:[#allocation5 + $0x154] sm:$0xf0]  ;;  %v890_v34 = vor.u32 %v1131_v28, %v889_v27  ;;  %v817_v36 = vld [vmem:[#allocation5 + $0x40] sm:$0xf] }
  0x19   :  { %v1017_v32 = vld [vmem:[#allocation5 + $0x1d0] sm:$0xf]  ;;  %v1163_v33 = vld [vmem:[#allocation5 + $0x1d4] sm:$0xf0]  ;;  %485 = vmatpush.bf16.msra.mxu1 %v898_v18  ;;  %v954_v35 = vor.u32 %v1147_v31, %v953_v29  ;;  %v1113_v37 = vld [vmem:[#allocation5 + $0x44] sm:$0xf0] }
  0x1a   :  { %498 = vmatpush.bf16.msra.mxu2 %v962_v22  ;;  %v881_v38 = vld [vmem:[#allocation5 + $0xc0] sm:$0xf]  ;;  %v1018_v39 = vor.u32 %v1163_v33, %v1017_v32  ;;  %v1129_v40 = vld [vmem:[#allocation5 + $0xc4] sm:$0xf0]  ;;  %v818_v45 = vor.u32 %v1113_v37, %v817_v36  ;;  %v809_v48 = vld [vmem:[#allocation5 + $0x30] sm:$0xf] }
  0x1b   :  { %511 = vmatpush.bf16.msra.mxu3 %v1026_v26  ;;  %v945_v41 = vld [vmem:[#allocation5 + $0x140] sm:$0xf]  ;;  %v1145_v42 = vld [vmem:[#allocation5 + $0x144] sm:$0xf0]  ;;  %v882_v46 = vor.u32 %v1129_v40, %v881_v38  ;;  %v1111_v49 = vld [vmem:[#allocation5 + $0x34] sm:$0xf0] }
  0x1c   :  { %v1009_v43 = vld [vmem:[#allocation5 + $0x1c0] sm:$0xf]  ;;  %v1161_v44 = vld [vmem:[#allocation5 + $0x1c4] sm:$0xf0]  ;;  %473 = vmatpush.bf16.msra.mxu0 %v826_v30  ;;  %v946_v47 = vor.u32 %v1145_v42, %v945_v41  ;;  %v873_v50 = vld [vmem:[#allocation5 + $0xb0] sm:$0xf]  ;;  %v810_v57 = vor.u32 %v1111_v49, %v809_v48 }
  0x1d   :  { %486 = vmatpush.bf16.msra.mxu1 %v890_v34  ;;  %v1010_v51 = vor.u32 %v1161_v44, %v1009_v43  ;;  %v1127_v52 = vld [vmem:[#allocation5 + $0xb4] sm:$0xf0]  ;;  %v937_v53 = vld [vmem:[#allocation5 + $0x130] sm:$0xf]  ;;  %v801_v60 = vld [vmem:[#allocation5 + $0x20] sm:$0xf] }
  0x1e   :  { %499 = vmatpush.bf16.msra.mxu2 %v954_v35  ;;  %v1143_v54 = vld [vmem:[#allocation5 + $0x134] sm:$0xf0]  ;;  %v1001_v55 = vld [vmem:[#allocation5 + $0x1b0] sm:$0xf]  ;;  %v874_v58 = vor.u32 %v1127_v52, %v873_v50  ;;  %v1109_v61 = vld [vmem:[#allocation5 + $0x24] sm:$0xf0] }
  0x1f   :  { %512 = vmatpush.bf16.msra.mxu3 %v1018_v39  ;;  %v1159_v56 = vld [vmem:[#allocation5 + $0x1b4] sm:$0xf0]  ;;  %v938_v59 = vor.u32 %v1143_v54, %v937_v53  ;;  %v865_v62 = vld [vmem:[#allocation5 + $0xa0] sm:$0xf]  ;;  %v1125_v0 = vld [vmem:[#allocation5 + $0xa4] sm:$0xf0]  ;;  %v802_v5 = vor.u32 %v1109_v61, %v801_v60 }
  0x20   :  { %474 = vmatpush.bf16.msra.mxu0 %v818_v45  ;;  %v1002_v63 = vor.u32 %v1159_v56, %v1001_v55  ;;  %v929_v1 = vld [vmem:[#allocation5 + $0x120] sm:$0xf]  ;;  %v1141_v2 = vld [vmem:[#allocation5 + $0x124] sm:$0xf0]  ;;  %v866_v6 = vor.u32 %v1125_v0, %v865_v62  ;;  %v793_v8 = vld [vmem:[#allocation5 + $0x10] sm:$0xf] }
  0x21   :  { %487 = vmatpush.bf16.msra.mxu1 %v882_v46  ;;  %v993_v3 = vld [vmem:[#allocation5 + $0x1a0] sm:$0xf]  ;;  %v1157_v4 = vld [vmem:[#allocation5 + $0x1a4] sm:$0xf0]  ;;  %v930_v7 = vor.u32 %v1141_v2, %v929_v1  ;;  %v1107_v9 = vld [vmem:[#allocation5 + $0x14] sm:$0xf0] }
  0x22   :  { %500 = vmatpush.bf16.msra.mxu2 %v946_v47  ;;  %v857_v10 = vld [vmem:[#allocation5 + $0x90] sm:$0xf]  ;;  %v994_v11 = vor.u32 %v1157_v4, %v993_v3  ;;  %v1123_v12 = vld [vmem:[#allocation5 + $0x94] sm:$0xf0]  ;;  %v794_v17 = vor.u32 %v1107_v9, %v793_v8  ;;  %v785_v18 = vld [vmem:[#allocation5] sm:$0xf] }
  0x23   :  { %513 = vmatpush.bf16.msra.mxu3 %v1010_v51  ;;  %v921_v13 = vld [vmem:[#allocation5 + $0x110] sm:$0xf]  ;;  %v1139_v14 = vld [vmem:[#allocation5 + $0x114] sm:$0xf0]  ;;  %v1105_v19 = vld [vmem:[#allocation5 + $0x4] sm:$0xf0]  ;;  %v858_v20 = vor.u32 %v1123_v12, %v857_v10 }
  0x24   :  { %475 = vmatpush.bf16.msra.mxu0 %v810_v57  ;;  %v985_v15 = vld [vmem:[#allocation5 + $0x190] sm:$0xf]  ;;  %v1155_v16 = vld [vmem:[#allocation5 + $0x194] sm:$0xf0]  ;;  %v922_v21 = vor.u32 %v1139_v14, %v921_v13  ;;  %v849_v22 = vld [vmem:[#allocation5 + $0x80] sm:$0xf]  ;;  %v786_v32 = vor.u32 %v1105_v19, %v785_v18 }
  0x25   :  { %488 = vmatpush.bf16.msra.mxu1 %v874_v58  ;;  %v1121_v23 = vld [vmem:[#allocation5 + $0x84] sm:$0xf0]  ;;  %v913_v24 = vld [vmem:[#allocation5 + $0x100] sm:$0xf]  ;;  %v986_v25 = vor.u32 %v1155_v16, %v985_v15  ;;  %v1118_v29 = vld [vmem:[#allocation5 + $0x74] sm:$0xf] }
  0x26   :  { %501 = vmatpush.bf16.msra.mxu2 %v938_v59  ;;  %v1137_v26 = vld [vmem:[#allocation5 + $0x104] sm:$0xf0]  ;;  %v977_v27 = vld [vmem:[#allocation5 + $0x180] sm:$0xf]  ;;  %v843_v30 = vld [vmem:[#allocation5 + $0x78] sm:$0xf0]  ;;  %v850_v36 = vor.u32 %v1121_v23, %v849_v22 }
  0x27   :  { %514 = vmatpush.bf16.msra.mxu3 %v1002_v63  ;;  %v1153_v28 = vld [vmem:[#allocation5 + $0x184] sm:$0xf0]  ;;  %v1134_v31 = vld [vmem:[#allocation5 + $0xf4] sm:$0xf]  ;;  %v907_v33 = vld [vmem:[#allocation5 + $0xf8] sm:$0xf0]  ;;  %v914_v37 = vor.u32 %v1137_v26, %v913_v24  ;;  %v846_v42 = vor.u32 %v1118_v29, %v843_v30 }
  0x28   :  { %476 = vmatpush.bf16.msra.mxu0 %v802_v5  ;;  %v1150_v34 = vld [vmem:[#allocation5 + $0x174] sm:$0xf]  ;;  %v971_v35 = vld [vmem:[#allocation5 + $0x178] sm:$0xf0]  ;;  %v978_v41 = vor.u32 %v1153_v28, %v977_v27  ;;  %v1116_v43 = vld [vmem:[#allocation5 + $0x64] sm:$0xf]  ;;  %v910_v46 = vor.u32 %v1134_v31, %v907_v33 }
  0x29   :  { %489 = vmatpush.bf16.msra.mxu1 %v866_v6  ;;  %v1166_v38 = vld [vmem:[#allocation5 + $0x1f4] sm:$0xf]  ;;  %v1035_v39 = vld [vmem:[#allocation5 + $0x1f8] sm:$0xf0]  ;;  %v73_v44 = vld [vmem:[#allocation3] sm:$0xff]  ;;  %v974_v47 = vor.u32 %v1150_v34, %v971_v35  ;;  %vm775_vm6 = vcmask 7168  }
  0x2a   :  { %502 = vmatpush.bf16.msra.mxu2 %v930_v7  ;;  %v75_v40 = vld [vmem:[#allocation3 + $0x10] sm:$0xff]  ;;  %v76_v45 = vld [vmem:[#allocation3 + $0x18] sm:$0xff]  ;;  %v835_v48 = vld [vmem:[#allocation5 + $0x68] sm:$0xf0]  ;;  %v1038_v51 = vor.u32 %v1166_v38, %v1035_v39  ;;  %v1335_v58 = vpack.c.bf16 %v73_v44, %v73_v44 }
  0x2b   :  { %515 = vmatpush.bf16.msra.mxu3 %v994_v11  ;;  %v1132_v49 = vld [vmem:[#allocation5 + $0xe4] sm:$0xf]  ;;  %v74_v50 = vld [vmem:[#allocation3 + $0x8] sm:$0xff]  ;;  %v1333_v55 = vpack.c.bf16 %v75_v40, %v75_v40  ;;  %v1337_v59 = vpack.c.bf16 %v76_v45, %v76_v45  ;;  %v838_v60 = vor.u32 %v1116_v43, %v835_v48  ;;  %v1114_v0 = vld [vmem:[#allocation5 + $0x54] sm:$0xf] }
  0x2c   :  { %477 = vmatpush.bf16.msra.mxu0 %v794_v17  ;;  %v899_v52 = vld [vmem:[#allocation5 + $0xe8] sm:$0xf0]  ;;  %v1148_v53 = vld [vmem:[#allocation5 + $0x164] sm:$0xf]  ;;  %v1339_v61 = vpack.c.bf16 %v74_v50, %v74_v50  ;;  %v827_v1 = vld [vmem:[#allocation5 + $0x58] sm:$0xf0] }
  0x2d   :  { %490 = vmatpush.bf16.msra.mxu1 %v858_v20  ;;  %v963_v54 = vld [vmem:[#allocation5 + $0x168] sm:$0xf0]  ;;  %v1164_v56 = vld [vmem:[#allocation5 + $0x1e4] sm:$0xf]  ;;  %v902_v62 = vor.u32 %v1132_v49, %v899_v52  ;;  %v1130_v2 = vld [vmem:[#allocation5 + $0xd4] sm:$0xf]  ;;  %v830_v9 = vor.u32 %v1114_v0, %v827_v1 }
  0x2e   :  { %503 = vmatpush.bf16.msra.mxu2 %v922_v21  ;;  %v1027_v57 = vld [vmem:[#allocation5 + $0x1e8] sm:$0xf0]  ;;  %v966_v63 = vor.u32 %v1148_v53, %v963_v54  ;;  %v891_v4 = vld [vmem:[#allocation5 + $0xd8] sm:$0xf0]  ;;  %v1146_v5 = vld [vmem:[#allocation5 + $0x154] sm:$0xf] }
  0x2f   :  { %516 = vmatpush.bf16.msra.mxu3 %v986_v25  ;;  %v1030_v3 = vor.u32 %v1164_v56, %v1027_v57  ;;  %v955_v6 = vld [vmem:[#allocation5 + $0x158] sm:$0xf0]  ;;  %v1162_v7 = vld [vmem:[#allocation5 + $0x1d4] sm:$0xf]  ;;  %v894_v10 = vor.u32 %v1130_v2, %v891_v4  ;;  %v1112_v12 = vld [vmem:[#allocation5 + $0x44] sm:$0xf] }
  0x30   :  { %478 = vmatpush.bf16.msra.mxu0 %v786_v32  ;;  %v1019_v8 = vld [vmem:[#allocation5 + $0x1d8] sm:$0xf0]  ;;  %v958_v11 = vor.u32 %v1146_v5, %v955_v6  ;;  %v819_v13 = vld [vmem:[#allocation5 + $0x48] sm:$0xf0]  ;;  %v1128_v14 = vld [vmem:[#allocation5 + $0xc4] sm:$0xf] }
  0x31   :  { %491 = vmatpush.bf16.msra.mxu1 %v850_v36  ;;  %v1022_v15 = vor.u32 %v1162_v7, %v1019_v8  ;;  %v883_v16 = vld [vmem:[#allocation5 + $0xc8] sm:$0xf0]  ;;  %v1144_v17 = vld [vmem:[#allocation5 + $0x144] sm:$0xf]  ;;  %v822_v21 = vor.u32 %v1112_v12, %v819_v13  ;;  %v1110_v24 = vld [vmem:[#allocation5 + $0x34] sm:$0xf] }
  0x32   :  { %504 = vmatpush.bf16.msra.mxu2 %v914_v37  ;;  %v947_v18 = vld [vmem:[#allocation5 + $0x148] sm:$0xf0]  ;;  %v1160_v19 = vld [vmem:[#allocation5 + $0x1c4] sm:$0xf]  ;;  %v886_v22 = vor.u32 %v1128_v14, %v883_v16  ;;  %v811_v25 = vld [vmem:[#allocation5 + $0x38] sm:$0xf0] }
  0x33   :  { %517 = vmatpush.bf16.msra.mxu3 %v978_v41  ;;  %479 = vmatmul.bf16.vlgmr.msra.gmra.mxu0 %v1335_v58  ;;  %v1011_v20 = vld [vmem:[#allocation5 + $0x1c8] sm:$0xf0]  ;;  %v950_v23 = vor.u32 %v1144_v17, %v947_v18  ;;  %v1126_v26 = vld [vmem:[#allocation5 + $0xb4] sm:$0xf]  ;;  %v875_v28 = vld [vmem:[#allocation5 + $0xb8] sm:$0xf0]  ;;  %v814_v33 = vor.u32 %v1110_v24, %v811_v25 }
  0x34   :  { %523 = vmatpush.bf16.msrb.mxu0 %v846_v42  ;;  %492 = vmatmul.bf16.vlgmr.msra.gmra.mxu1 %v1339_v61  ;;  %v1014_v27 = vor.u32 %v1160_v19, %v1011_v20  ;;  %v1142_v29 = vld [vmem:[#allocation5 + $0x134] sm:$0xf]  ;;  %v939_v30 = vld [vmem:[#allocation5 + $0x138] sm:$0xf0]  ;;  %v1108_v34 = vld [vmem:[#allocation5 + $0x24] sm:$0xf]  ;;  %v878_v36 = vor.u32 %v1126_v26, %v875_v28 }
  0x35   :  { %536 = vmatpush.bf16.msrb.mxu1 %v910_v46  ;;  %505 = vmatmul.bf16.vlgmr.msra.gmra.mxu2 %v1333_v55  ;;  %v1158_v31 = vld [vmem:[#allocation5 + $0x1b4] sm:$0xf]  ;;  %v1003_v32 = vld [vmem:[#allocation5 + $0x1b8] sm:$0xf0]  ;;  %v803_v35 = vld [vmem:[#allocation5 + $0x28] sm:$0xf0]  ;;  %v942_v37 = vor.u32 %v1142_v29, %v939_v30 }
  0x36   :  { %549 = vmatpush.bf16.msrb.mxu2 %v974_v47  ;;  %518 = vmatmul.bf16.vlgmr.msra.gmra.mxu3 %v1337_v59  ;;  %v1124_v38 = vld [vmem:[#allocation5 + $0xa4] sm:$0xf]  ;;  %v1006_v39 = vor.u32 %v1158_v31, %v1003_v32  ;;  %v867_v40 = vld [vmem:[#allocation5 + $0xa8] sm:$0xf0]  ;;  %v806_v45 = vor.u32 %v1108_v34, %v803_v35  ;;  %v1106_v48 = vld [vmem:[#allocation5 + $0x14] sm:$0xf] }
  0x37   :  { %562 = vmatpush.bf16.msrb.mxu3 %v1038_v51  ;;  %v1140_v41 = vld [vmem:[#allocation5 + $0x124] sm:$0xf]  ;;  %v931_v42 = vld [vmem:[#allocation5 + $0x128] sm:$0xf0]  ;;  %v870_v46 = vor.u32 %v1124_v38, %v867_v40  ;;  %v795_v49 = vld [vmem:[#allocation5 + $0x18] sm:$0xf0] }
  0x38   :  { %524 = vmatpush.bf16.msrb.mxu0 %v838_v60  ;;  %v1156_v43 = vld [vmem:[#allocation5 + $0x1a4] sm:$0xf]  ;;  %v995_v44 = vld [vmem:[#allocation5 + $0x1a8] sm:$0xf0]  ;;  %v934_v47 = vor.u32 %v1140_v41, %v931_v42  ;;  %v1122_v50 = vld [vmem:[#allocation5 + $0x94] sm:$0xf]  ;;  %v798_v60 = vor.u32 %v1106_v48, %v795_v49 }
  0x39   :  { %537 = vmatpush.bf16.msrb.mxu1 %v902_v62  ;;  %v998_v51 = vor.u32 %v1156_v43, %v995_v44  ;;  %v859_v52 = vld [vmem:[#allocation5 + $0x98] sm:$0xf0]  ;;  %v1138_v53 = vld [vmem:[#allocation5 + $0x114] sm:$0xf]  ;;  %v1104_v0 = vld [vmem:[#allocation5 + $0x4] sm:$0xf] }
  0x3a   :  { %550 = vmatpush.bf16.msrb.mxu2 %v966_v63  ;;  %v923_v54 = vld [vmem:[#allocation5 + $0x118] sm:$0xf0]  ;;  %v1154_v56 = vld [vmem:[#allocation5 + $0x194] sm:$0xf]  ;;  %v862_v62 = vor.u32 %v1122_v50, %v859_v52  ;;  %v787_v1 = vld [vmem:[#allocation5 + $0x8] sm:$0xf0] }
  0x3b   :  { %563 = vmatpush.bf16.msrb.mxu3 %v1030_v3  ;;  %v987_v57 = vld [vmem:[#allocation5 + $0x198] sm:$0xf0]  ;;  %v926_v63 = vor.u32 %v1138_v53, %v923_v54  ;;  %v1120_v2 = vld [vmem:[#allocation5 + $0x84] sm:$0xf]  ;;  %v851_v4 = vld [vmem:[#allocation5 + $0x88] sm:$0xf0] }
  0x3c   :  { %525 = vmatpush.bf16.msrb.mxu0 %v830_v9  ;;  %v990_v3 = vor.u32 %v1154_v56, %v987_v57  ;;  %v1136_v5 = vld [vmem:[#allocation5 + $0x104] sm:$0xf]  ;;  %v915_v6 = vld [vmem:[#allocation5 + $0x108] sm:$0xf0]  ;;  %v790_v9 = vor.u32 %v1104_v0, %v787_v1  ;;  %v1175_v13 = vld [vmem:[#allocation7 + $0x38] sm:$0xff] }
  0x3d   :  { %538 = vmatpush.bf16.msrb.mxu1 %v894_v10  ;;  %v1152_v7 = vld [vmem:[#allocation5 + $0x184] sm:$0xf]  ;;  %v979_v8 = vld [vmem:[#allocation5 + $0x188] sm:$0xf0]  ;;  %v854_v10 = vor.u32 %v1120_v2, %v851_v4  ;;  %v1174_v14 = vld [vmem:[#allocation7 + $0x30] sm:$0xff] }
  0x3e   :  { %551 = vmatpush.bf16.msrb.mxu2 %v958_v11  ;;  %v918_v11 = vor.u32 %v1136_v5, %v915_v6  ;;  %v982_v12 = vor.u32 %v1152_v7, %v979_v8  ;;  %v1172_v16 = vld [vmem:[#allocation7 + $0x20] sm:$0xff]  ;;  %v1171_v17 = vld [vmem:[#allocation7 + $0x18] sm:$0xff]  ;;  %v1170_v18 = vld [vmem:[#allocation7 + $0x10] sm:$0xff] }
  0x3f   :  { %564 = vmatpush.bf16.msrb.mxu3 %v1022_v15  ;;  %v1173_v15 = vld [vmem:[#allocation7 + $0x28] sm:$0xff]  ;;  %v1183_v20 = vld [vmem:[#allocation7 + $0x78] sm:$0xff]  ;;  %v1178_v24 = vld [vmem:[#allocation7 + $0x50] sm:$0xff] }
  0x40   :  { %526 = vmatpush.bf16.msrb.mxu0 %v822_v21  ;;  %v1169_v19 = vld [vmem:[#allocation7 + $0x8] sm:$0xff]  ;;  %v1168_v21 = vld [vmem:[#allocation7] sm:$0xff]  ;;  %v1191_v0 = vld [vmem:[%s1365_s4] ss:$0 sm:$0xff] }
  0x41   :  { %539 = vmatpush.bf16.msrb.mxu1 %v886_v22  ;;  %v1177_v30 = vld [vmem:[#allocation7 + $0x48] sm:$0xff]  ;;  %v1192_v4 = vld [vmem:[%s1366_s5] ss:$0 sm:$0xff] }
  0x42   :  { %552 = vmatpush.bf16.msrb.mxu2 %v950_v23  ;;  %v1179_v23 = vld [vmem:[#allocation7 + $0x58] sm:$0xff] }
  0x43   :  { %565 = vmatpush.bf16.msrb.mxu3 %v1014_v27 }
  0x44   :  { %527 = vmatpush.bf16.msrb.mxu0 %v814_v33 }
  0x45   :  { %540 = vmatpush.bf16.msrb.mxu1 %v878_v36  ;;  %v1176_v36 = vld [vmem:[#allocation7 + $0x40] sm:$0xff] }
  0x46   :  { %553 = vmatpush.bf16.msrb.mxu2 %v942_v37 }
  0x47   :  { %566 = vmatpush.bf16.msrb.mxu3 %v1006_v39 }
  0x48   :  { %528 = vmatpush.bf16.msrb.mxu0 %v806_v45 }
  0x49   :  { %541 = vmatpush.bf16.msrb.mxu1 %v870_v46 }
  0x4a   :  { %554 = vmatpush.bf16.msrb.mxu2 %v934_v47 }
  0x4b   :  { %567 = vmatpush.bf16.msrb.mxu3 %v998_v51 }
  0x4c   :  { %529 = vmatpush.bf16.msrb.mxu0 %v798_v60 }
  0x4d   :  { %542 = vmatpush.bf16.msrb.mxu1 %v862_v62 }
  0x4e   :  { %555 = vmatpush.bf16.msrb.mxu2 %v926_v63 }
  0x4f   :  { %568 = vmatpush.bf16.msrb.mxu3 %v990_v3 }
  0x50   :  { %530 = vmatpush.bf16.msrb.mxu0 %v790_v9  ;;  %v1193_v9 = vld [vmem:[#allocation2] ss:$0 sm:$0xff] }
  0x51   :  { %543 = vmatpush.bf16.msrb.mxu1 %v854_v10 }
  0x52   :  { %556 = vmatpush.bf16.msrb.mxu2 %v918_v11 }
  0x53   :  { %569 = vmatpush.bf16.msrb.mxu3 %v982_v12  ;;  %531 = vmatmul.bf16.vlgmr.msrb.gmra.mxu0 %v1335_v58  ;;  %v1182_v58 = vld [vmem:[#allocation7 + $0x70] sm:$0xff] }
  0x54   :  { %715 = vmatpush.bf16.msra.mxu0 %v1175_v13  ;;  %544 = vmatmul.bf16.vlgmr.msrb.gmra.mxu1 %v1339_v61  ;;  %v145_v61 = vld [vmem:[%s1363_s2] sm:$0x3] }
  0x55   :  { %557 = vmatmul.bf16.vlgmr.msrb.gmra.mxu2 %v1333_v55  ;;  %728 = vmatpush.bf16.msra.mxu1 %v1183_v20  ;;  %v1181_v55 = vld [vmem:[#allocation7 + $0x68] sm:$0xff]  ;;  %v147_v22 = vperm.slane %v145_v61, 0  ;;  %v148_v42 = vperm.slane %v145_v61, 1 }
  0x56   :  { %570 = vmatmul.bf16.vlgmr.msrb.gmra.mxu3 %v1337_v59  ;;  %v1180_v59 = vld [vmem:[#allocation7 + $0x60] sm:$0xff] }
  0x58   :  { %716 = vmatpush.bf16.msra.mxu0 %v1174_v14 }
  0x59   :  { %729 = vmatpush.bf16.msra.mxu1 %v1182_v58 }
  0x5c   :  { %717 = vmatpush.bf16.msra.mxu0 %v1173_v15 }
  0x5d   :  { %730 = vmatpush.bf16.msra.mxu1 %v1181_v55 }
  0x60   :  { %718 = vmatpush.bf16.msra.mxu0 %v1172_v16 }
  0x61   :  { %731 = vmatpush.bf16.msra.mxu1 %v1180_v59 }
  0x64   :  { %719 = vmatpush.bf16.msra.mxu0 %v1171_v17 }
  0x65   :  { %732 = vmatpush.bf16.msra.mxu1 %v1179_v23 }
  0x68   :  { %720 = vmatpush.bf16.msra.mxu0 %v1170_v18 }
  0x69   :  { %733 = vmatpush.bf16.msra.mxu1 %v1178_v24 }
  0x6c   :  { %721 = vmatpush.bf16.msra.mxu0 %v1169_v19 }
  0x6d   :  { %734 = vmatpush.bf16.msra.mxu1 %v1177_v30 }
  0x70   :  { %722 = vmatpush.bf16.msra.mxu0 %v1168_v21 }
  0x71   :  { %735 = vmatpush.bf16.msra.mxu1 %v1176_v36 }
  0xb0   :  { %v480_v25 = vpop.f32.mrf.mxu0 }
  0xb1   :  { %v481_v26 = vadd.f32 %v480_v25, %v147_v22  ;;  %v493_v27 = vpop.f32.mrf.mxu1 }
  0xb3   :  { %v494_v28 = vadd.f32 %v493_v27, %v481_v26 }
  0xb8   :  { %v506_v29 = vpop.f32.mrf.mxu2  ;;  %v482_v34 = vpop.f32.mrf.mxu0 }
  0xb9   :  { %v507_v31 = vadd.f32 %v506_v29, %v494_v28  ;;  %v519_v32 = vpop.f32.mrf.mxu3  ;;  %v495_v35 = vpop.f32.mrf.mxu1 }
  0xbb   :  { %v520_v33 = vadd.f32 %v519_v32, %v507_v31 }
  0xbd   :  { %vm575_vm0 = vcmp.gt.f32.partialorder %v520_v33, 0.0  ;;  %v577_v37 = vmul.f32 0.2, %v520_v33 }
  0xbf   :  { %v579_v38 = vsel %vm575_vm0, %v520_v33, %v577_v37 }
  0xc0   :  { %v581_v39 = vpack.c.bf16 %v579_v38, %v579_v38  ;;  %v508_v40 = vpop.f32.mrf.mxu2 }
  0xc1   :  { %v521_v41 = vpop.f32.mrf.mxu3 }
  0xc2   :  { %723 = vmatmul.bf16.vlgmr.msra.gmra.mxu0 %v581_v39 }
  0xd0   :  { %v532_v43 = vpop.f32.mrf.mxu0 }
  0xd1   :  { %v533_v44 = vadd.f32 %v532_v43, %v148_v42  ;;  %v545_v45 = vpop.f32.mrf.mxu1 }
  0xd3   :  { %v546_v46 = vadd.f32 %v545_v45, %v533_v44 }
  0xd8   :  { %v558_v47 = vpop.f32.mrf.mxu2  ;;  %v534_v50 = vpop.f32.mrf.mxu0 }
  0xd9   :  { %v559_v48 = vadd.f32 %v558_v47, %v546_v46  ;;  %v571_v49 = vpop.f32.mrf.mxu3  ;;  %v547_v51 = vpop.f32.mrf.mxu1 }
  0xdb   :  { %v572_v52 = vadd.f32 %v571_v49, %v559_v48 }
  0xdd   :  { %vm576_vm1 = vcmp.gt.f32.partialorder %v572_v52, 0.0  ;;  %v578_v53 = vmul.f32 0.2, %v572_v52 }
  0xdf   :  { %v580_v54 = vsel %vm576_vm1, %v572_v52, %v578_v53 }
  0xe0   :  { %v582_v56 = vpack.c.bf16 %v580_v54, %v580_v54  ;;  %v560_v57 = vpop.f32.mrf.mxu2 }
  0xe1   :  { %v573_v60 = vpop.f32.mrf.mxu3 }
  0xe2   :  { %736 = vmatmul.bf16.vlgmr.msra.gmra.mxu1 %v582_v56 }
 0x13f   :  { %v724_v62 = vpop.f32.mrf.mxu0 }
 0x140   :  { %v725_v1 = vadd.f32 %v1191_v0, %v724_v62 }
 0x147   :  { %v726_v63 = vpop.f32.mrf.mxu0 }
 0x15f   :  { %v737_v2 = vpop.f32.mrf.mxu1 }
 0x160   :  { %v738_v3 = vadd.f32 %v737_v2, %v725_v1 }
 0x162   :  { %v742_v5 = vmul.f32 0.2, %v738_v3  ;;  %vm741_vm2 = vcmp.gt.f32.partialorder %v738_v3, 0.0 }
 0x164   :  { %v743_v6 = vsel %vm741_vm2, %v738_v3, %v742_v5 }
 0x165   :  { %v748_v7 = vmul.f32 %v1192_v4, %v743_v6 }
 0x167   :  { %v739_v8 = vpop.f32.mrf.mxu1  ;;  %749 = vadd.xlane.f32.xlu0 %v748_v7 }
 0x1da   :  { %v750_v10 = vpop.xlane.xlu0 %749 }
 0x1db   :  { %v755_v11 = vadd.f32 %v1193_v9, %v750_v10 }
 0x1dd   :  { %v1103_v12 = vmul.f32 -1.442695, %v755_v11 }
 0x1df   :  { %1194 = vpow2.f32 %v1103_v12 }
 0x1e5   :  { %v1195_v13 = vpop.eup %1194 }
 0x1e6   :  { %v759_v14 = vadd.f32 1.0, %v1195_v13 }
 0x1e8   :  { %1196 = vrcp.f32 %v759_v14  ;;  %v771_v18 = vand.u32 2147483648, %v759_v14  ;;  %v769_v20 = vand.u32 2147483647, %v759_v14  ;;  %vm765_vm4 = vweird.f32 %v759_v14 }
 0x1ea   :  { %v772_v58 = vor.u32 1.1754944e-38, %v771_v18  ;;  %vm770_vm7 = vcmp.eq.f32.partialorder %v769_v20, 8.507059e+37 }
 0x1ee   :  { %v1197_v15 = vpop.eup %1196 }
 0x1ef   :  { %v761_v16 = vmul.f32 %v1197_v15, %v759_v14  ;;  %vm766_vm3 = vweird.f32 %v1197_v15 }
 0x1f0   :  { %vm767_vm5 = vmor %vm765_vm4, %vm766_vm3 }
 0x1f1   :  { %v762_v17 = vsub.f32 1.0, %v761_v16 }
 0x1f3   :  { %v763_v19 = vmul.f32 %v1197_v15, %v762_v17 }
 0x1f5   :  { %v764_v21 = vadd.f32 %v1197_v15, %v763_v19 }
 0x1f7   :  { %v768_v55 = vsel %vm767_vm5, %v1197_v15, %v764_v21 }
 0x1f8   :  { %v773_v59 = vsel %vm770_vm7, %v772_v58, %v768_v55 }
 0x1f9   :  { %776 = vst.msk [vmem:[%s1368_s7] sm:$0xff] %vm775_vm6, %v773_v59 }
 0x1fa   :  { %781 = vsyncpa [#allocation4], 1 }
 0x1fb   :  { %782 = vsyncpa [#allocation6], 1 }

</bundles_post_ra>
